<compile_context>
chip_gen: v5e
topology: v5e:2x2
jax: 0.10.0
libtpu: 0.0.40
codegen_flags: <defaults>
</compile_context>

<pallas_src>
import functools

import jax
import jax.numpy as jnp
from jax.experimental import pallas as pl
from jax.experimental.pallas import tpu as pltpu


def _round_up(x, m):
    return (x + m - 1) // m * m


def _cdiv(a, b):
    return (a + b - 1) // b


def _padded_tile_bytes(rows, cols, itemsize):
    """VMEM bytes of a (rows, cols) buffer, accounting for (sublane, 128-lane)
    tile padding (sublane = 8 for 4-byte dtypes, 16 for 2-byte dtypes)."""
    sublane = 8 * (4 // itemsize)
    return (_round_up(max(rows, 1), sublane)
            * _round_up(max(cols, 1), 128) * itemsize)


def _ncd_kernel(stu_ref, kdiff_ref, edisc_ref, kn_ref,
                w1_ref, b1_ref, w2_ref, b2_ref, w3t_ref, b3_ref,
                out_ref):
    # bf16 embedding rows -> f32 before the sigmoids (keep VPU/EUP math in f32).
    stu_emb = jax.nn.sigmoid(stu_ref[...].astype(jnp.float32))           # (TB, K)
    k_difficulty = jax.nn.sigmoid(kdiff_ref[...].astype(jnp.float32))    # (TB, K)
    e_discrimination = jax.nn.sigmoid(
        edisc_ref[...].astype(jnp.float32)) * 10.0                       # (TB, 1)

    # input_x = e_disc * (stu - k_diff) * kn_emb   (f32 elementwise, VPU)
    input_x = (e_discrimination * (stu_emb - k_difficulty)
               * kn_ref[...].astype(jnp.float32))

    # prednet_full1 + sigmoid (dropout = identity, eval mode)
    # bf16 MXU operands, f32 accumulation.
    h1 = jax.nn.sigmoid(
        jnp.dot(input_x.astype(jnp.bfloat16), w1_ref[...],
                preferred_element_type=jnp.float32) + b1_ref[...])

    # prednet_full2 + sigmoid (dropout = identity, eval mode)
    h2 = jax.nn.sigmoid(
        jnp.dot(h1.astype(jnp.bfloat16), w2_ref[...],
                preferred_element_type=jnp.float32) + b2_ref[...])

    # prednet_full3 + sigmoid -> (TB, 1)
    # N=1 output column: VPU multiply + XLU lane reduction instead of a
    # 1-column MXU matmul (which would use 1/256 of the MXU).
    logits = jnp.sum(h2 * w3t_ref[...], axis=-1, keepdims=True) + b3_ref[...]
    out_ref[...] = jax.nn.sigmoid(logits)


@functools.partial(jax.jit, static_argnames=("tile_b",))
def ncd_forward(stu_id, exer_id, kn_emb, params, *, tile_b=1024):
    """NCD forward.

    stu_id:  int32 [B]
    exer_id: int32 [B]
    kn_emb:  float [B, K]  (knowledge relevancy vectors; bf16 also accepted)
    returns: f32   [B, 1]
    """
    B, K = kn_emb.shape
    L1 = params["w1"].shape[1]
    L2 = params["w2"].shape[1]

    # --- glue: embedding gathers (bf16 rows; sigmoid applied in-kernel) ---
    # TODO(synk): fuse these gathers in-kernel to remove the HBM round trip.
    stu_rows = jnp.take(params["student_emb"], stu_id, axis=0)          # (B, K) bf16
    kdiff_rows = jnp.take(params["k_difficulty"], exer_id, axis=0)      # (B, K) bf16
    edisc_rows = jnp.take(params["e_discrimination"], exer_id, axis=0)  # (B, 1) bf16

    # --- batch tiling: 16-row alignment (bf16 sublane packing) ---
    tb = _round_up(min(int(tile_b), _round_up(B, 16)), 16)
    # v7x megacore: ensure >= 2 grid steps so the "parallel" axis can shard
    # across the 2 TensorCores, once the batch is big enough to split.
    if B >= 256 and _cdiv(B, tb) < 2:
        tb = _round_up(_cdiv(B, 2), 16)
    b_pad = _round_up(B, tb)
    if b_pad != B:
        pad = ((0, b_pad - B), (0, 0))
        stu_rows = jnp.pad(stu_rows, pad)
        kdiff_rows = jnp.pad(kdiff_rows, pad)
        edisc_rows = jnp.pad(edisc_rows, pad)
        kn_emb = jnp.pad(kn_emb, pad)

    # MXU weights in bf16 (f32 accumulation in-kernel); biases / final row f32.
    w1 = params["w1"].astype(jnp.bfloat16)
    w2 = params["w2"].astype(jnp.bfloat16)
    w3t = params["w3"].T.astype(jnp.float32)        # (1, L2) row for the VPU reduce

    # --- explicit VMEM budget: 2x-buffered tiles + resident weights + headroom ---
    kn_isz = jnp.dtype(kn_emb.dtype).itemsize
    step_in = (2 * _padded_tile_bytes(tb, K, 2)           # stu + k_diff rows (bf16)
               + _padded_tile_bytes(tb, 1, 2)             # e_disc rows (bf16)
               + _padded_tile_bytes(tb, K, kn_isz))       # kn_emb
    step_out = _padded_tile_bytes(tb, 1, 4)
    weight_bytes = (_padded_tile_bytes(K, L1, 2) + _padded_tile_bytes(1, L1, 4)
                    + _padded_tile_bytes(L1, L2, 2) + _padded_tile_bytes(1, L2, 4)
                    + _padded_tile_bytes(1, L2, 4) + _padded_tile_bytes(1, 1, 4))
    vmem_limit = 2 * (step_in + step_out) + 2 * weight_bytes + (6 << 20)
    vmem_limit = int(max(16 << 20, min(48 << 20, vmem_limit)))

    out = pl.pallas_call(
        _ncd_kernel,
        out_shape=jax.ShapeDtypeStruct((b_pad, 1), jnp.float32),
        grid=(b_pad // tb,),
        in_specs=[
            # batch-tiled operands
            pl.BlockSpec((tb, K), lambda b: (b, 0)),     # stu rows (bf16)
            pl.BlockSpec((tb, K), lambda b: (b, 0)),     # k_difficulty rows (bf16)
            pl.BlockSpec((tb, 1), lambda b: (b, 0)),     # e_discrimination rows (bf16)
            pl.BlockSpec((tb, K), lambda b: (b, 0)),     # kn_emb
            # weights / biases: constant index maps -> stay VMEM-resident
            pl.BlockSpec((K, L1), lambda b: (0, 0)),     # W1 (bf16)
            pl.BlockSpec((1, L1), lambda b: (0, 0)),     # b1
            pl.BlockSpec((L1, L2), lambda b: (0, 0)),    # W2 (bf16)
            pl.BlockSpec((1, L2), lambda b: (0, 0)),     # b2
            pl.BlockSpec((1, L2), lambda b: (0, 0)),     # W3^T
            pl.BlockSpec((1, 1), lambda b: (0, 0)),      # b3
        ],
        out_specs=pl.BlockSpec((tb, 1), lambda b: (b, 0)),
        compiler_params=pltpu.CompilerParams(
            dimension_semantics=("parallel",),
            vmem_limit_bytes=vmem_limit),
    )(stu_rows, kdiff_rows, edisc_rows, kn_emb,
      w1, params["b1"], w2, params["b2"], w3t, params["b3"])
    return out[:B]


def init_params(key, student_n, exer_n, knowledge_n,
                prednet_len1=128, prednet_len2=64):
    """Deterministic xavier-normal init (weights), uniform-ish biases."""
    ks = jax.random.split(key, 9)

    def xavier(k, fan_in, fan_out, shape):
        std = jnp.sqrt(2.0 / (fan_in + fan_out))
        return jax.random.normal(k, shape, dtype=jnp.float32) * std

    params = {
        # Embedding tables stored bf16: halves the gathered-row DMA bytes fed
        # to the bandwidth-bound kernel; rows are upcast to f32 in-kernel.
        "student_emb": xavier(ks[0], student_n, knowledge_n,
                              (student_n, knowledge_n)).astype(jnp.bfloat16),
        "k_difficulty": xavier(ks[1], exer_n, knowledge_n,
                               (exer_n, knowledge_n)).astype(jnp.bfloat16),
        "e_discrimination": xavier(ks[2], exer_n, 1,
                                   (exer_n, 1)).astype(jnp.bfloat16),
        # prednet linears, stored as (in, out) so kernel does x @ W + b
        "w1": xavier(ks[3], knowledge_n, prednet_len1,
                     (knowledge_n, prednet_len1)),
        "b1": (jax.random.uniform(ks[4], (1, prednet_len1), jnp.float32)
               - 0.5) * 0.1,
        "w2": xavier(ks[5], prednet_len1, prednet_len2,
                     (prednet_len1, prednet_len2)),
        "b2": (jax.random.uniform(ks[6], (1, prednet_len2), jnp.float32)
               - 0.5) * 0.1,
        "w3": xavier(ks[7], prednet_len2, 1, (prednet_len2, 1)),
        "b3": (jax.random.uniform(ks[8], (1, 1), jnp.float32) - 0.5) * 0.1,
    }
    return params


def _reference_forward(stu_id, exer_id, kn_emb, params):
    """Pure-JAX f32 reference of the same forward pass (eval-mode dropout)."""
    stu_emb = jax.nn.sigmoid(
        jnp.take(params["student_emb"], stu_id, axis=0).astype(jnp.float32))
    k_diff = jax.nn.sigmoid(
        jnp.take(params["k_difficulty"], exer_id, axis=0).astype(jnp.float32))
    e_disc = jax.nn.sigmoid(
        jnp.take(params["e_discrimination"], exer_id,
                 axis=0).astype(jnp.float32)) * 10.0
    x = e_disc * (stu_emb - k_diff) * kn_emb
    h1 = jax.nn.sigmoid(x @ params["w1"] + params["b1"])
    h2 = jax.nn.sigmoid(h1 @ params["w2"] + params["b2"])
    return jax.nn.sigmoid(h2 @ params["w3"] + params["b3"])


if __name__ == "__main__":
    # small, module-consistent shapes
    student_n, exer_n, knowledge_n = 16, 16, 32
    prednet_len1, prednet_len2 = 128, 64
    batch = 8

    key = jax.random.PRNGKey(0)
    kp, k1, k2, k3 = jax.random.split(key, 4)

    params = init_params(kp, student_n, exer_n, knowledge_n,
                         prednet_len1, prednet_len2)

    stu_id = jax.random.randint(k1, (batch,), 0, student_n, dtype=jnp.int32)
    exer_id = jax.random.randint(k2, (batch,), 0, exer_n, dtype=jnp.int32)
    # knowledge relevancy vectors: binary mask like in NeuralCDM
    kn_emb = jax.random.bernoulli(k3, 0.5, (batch, knowledge_n)).astype(
        jnp.float32)

    out = ncd_forward(stu_id, exer_id, kn_emb, params)
    out = jax.block_until_ready(out)

    ref = _reference_forward(stu_id, exer_id, kn_emb, params)
    assert out.shape == (batch, 1)
    # bf16 MXU operands with f32 accumulation -> tolerance relaxed to ~1e-2.
    assert jnp.allclose(out, ref, atol=1e-2, rtol=1e-2), "mismatch vs reference"

    print("KERNEL_OK")
</pallas_src>

<mosaic_0001>
module attributes {stable_mosaic.version = 11 : i64} {
  func.func @_ncd_kernel(%arg0: i32, %arg1: memref<16x32xbf16, #tpu.memory_space<vmem>>, %arg2: memref<16x32xbf16, #tpu.memory_space<vmem>>, %arg3: memref<16x1xbf16, #tpu.memory_space<vmem>>, %arg4: memref<16x32xf32, #tpu.memory_space<vmem>>, %arg5: memref<32x128xbf16, #tpu.memory_space<vmem>>, %arg6: memref<1x128xf32, #tpu.memory_space<vmem>>, %arg7: memref<128x64xbf16, #tpu.memory_space<vmem>>, %arg8: memref<1x64xf32, #tpu.memory_space<vmem>>, %arg9: memref<1x64xf32, #tpu.memory_space<vmem>>, %arg10: memref<1x1xf32, #tpu.memory_space<vmem>>, %arg11: memref<16x1xf32, #tpu.memory_space<vmem>>) attributes {dimension_semantics = [#tpu.dimension_semantics<parallel>], iteration_bounds = array<i64: 1>, scalar_prefetch = 0 : i64, scratch_operands = 0 : i64, tpu.core_type = #tpu.core_type<tc>, window_params = [{transform_indices = @transform_0, window_bounds = array<i64: 16, 32>}, {transform_indices = @transform_1, window_bounds = array<i64: 16, 32>}, {transform_indices = @transform_2, window_bounds = array<i64: 16, 1>}, {transform_indices = @transform_3, window_bounds = array<i64: 16, 32>}, {pipeline_mode = #tpu.pipeline_mode<synchronous>, transform_indices = @transform_4, window_bounds = array<i64: 32, 128>}, {pipeline_mode = #tpu.pipeline_mode<synchronous>, transform_indices = @transform_5, window_bounds = array<i64: 1, 128>}, {pipeline_mode = #tpu.pipeline_mode<synchronous>, transform_indices = @transform_6, window_bounds = array<i64: 128, 64>}, {pipeline_mode = #tpu.pipeline_mode<synchronous>, transform_indices = @transform_7, window_bounds = array<i64: 1, 64>}, {pipeline_mode = #tpu.pipeline_mode<synchronous>, transform_indices = @transform_8, window_bounds = array<i64: 1, 64>}, {pipeline_mode = #tpu.pipeline_mode<synchronous>, transform_indices = @transform_9, window_bounds = array<i64: 1, 1>}, {transform_indices = @transform_10, window_bounds = array<i64: 16, 1>}]} {
    %c0 = arith.constant 0 : index
    %c0_0 = arith.constant 0 : index
    %0 = vector.load %arg1[%c0, %c0_0] : memref<16x32xbf16, #tpu.memory_space<vmem>>, vector<16x32xbf16>
    %1 = arith.extf %0 : vector<16x32xbf16> to vector<16x32xf32>
    %2 = arith.negf %1 : vector<16x32xf32>
    %3 = math.exp %2 : vector<16x32xf32>
    %cst = arith.constant 1.000000e+00 : f32
    %4 = vector.broadcast %cst : f32 to vector<16x32xf32>
    %5 = arith.addf %4, %3 : vector<16x32xf32>
    %6 = arith.divf %4, %5 : vector<16x32xf32>
    %c0_1 = arith.constant 0 : index
    %c0_2 = arith.constant 0 : index
    %7 = vector.load %arg2[%c0_1, %c0_2] : memref<16x32xbf16, #tpu.memory_space<vmem>>, vector<16x32xbf16>
    %8 = arith.extf %7 : vector<16x32xbf16> to vector<16x32xf32>
    %9 = arith.negf %8 : vector<16x32xf32>
    %10 = math.exp %9 : vector<16x32xf32>
    %cst_3 = arith.constant 1.000000e+00 : f32
    %11 = vector.broadcast %cst_3 : f32 to vector<16x32xf32>
    %12 = arith.addf %11, %10 : vector<16x32xf32>
    %13 = arith.divf %11, %12 : vector<16x32xf32>
    %c0_4 = arith.constant 0 : index
    %c0_5 = arith.constant 0 : index
    %14 = vector.load %arg3[%c0_4, %c0_5] : memref<16x1xbf16, #tpu.memory_space<vmem>>, vector<16x1xbf16>
    %15 = arith.extf %14 : vector<16x1xbf16> to vector<16x1xf32>
    %16 = arith.negf %15 : vector<16x1xf32>
    %17 = math.exp %16 : vector<16x1xf32>
    %cst_6 = arith.constant 1.000000e+00 : f32
    %18 = vector.broadcast %cst_6 : f32 to vector<16x1xf32>
    %19 = arith.addf %18, %17 : vector<16x1xf32>
    %20 = arith.divf %18, %19 : vector<16x1xf32>
    %cst_7 = arith.constant 1.000000e+01 : f32
    %21 = vector.broadcast %cst_7 : f32 to vector<16x1xf32>
    %22 = arith.mulf %20, %21 : vector<16x1xf32>
    %23 = arith.subf %6, %13 : vector<16x32xf32>
    %24 = vector.broadcast %22 : vector<16x1xf32> to vector<16x32xf32>
    %25 = arith.mulf %24, %23 : vector<16x32xf32>
    %c0_8 = arith.constant 0 : index
    %c0_9 = arith.constant 0 : index
    %26 = vector.load %arg4[%c0_8, %c0_9] : memref<16x32xf32, #tpu.memory_space<vmem>>, vector<16x32xf32>
    %27 = arith.mulf %25, %26 : vector<16x32xf32>
    %28 = arith.truncf %27 : vector<16x32xf32> to vector<16x32xbf16>
    %c0_10 = arith.constant 0 : index
    %c0_11 = arith.constant 0 : index
    %29 = vector.load %arg5[%c0_10, %c0_11] : memref<32x128xbf16, #tpu.memory_space<vmem>>, vector<32x128xbf16>
    %cst_12 = arith.constant dense<0.000000e+00> : vector<16x128xf32>
    %30 = tpu.matmul %28, %29, %cst_12 {dimension_numbers = #tpu.dot_dimension_numbers<[1], [0], [0], [1], [0, 0, 1, 1], [], []>} : vector<16x32xbf16>, vector<32x128xbf16>, vector<16x128xf32> -> vector<16x128xf32>
    %c0_13 = arith.constant 0 : index
    %c0_14 = arith.constant 0 : index
    %31 = vector.load %arg6[%c0_13, %c0_14] : memref<1x128xf32, #tpu.memory_space<vmem>>, vector<1x128xf32>
    %32 = vector.broadcast %31 : vector<1x128xf32> to vector<16x128xf32>
    %33 = arith.addf %30, %32 : vector<16x128xf32>
    %34 = arith.negf %33 : vector<16x128xf32>
    %35 = math.exp %34 : vector<16x128xf32>
    %cst_15 = arith.constant 1.000000e+00 : f32
    %36 = vector.broadcast %cst_15 : f32 to vector<16x128xf32>
    %37 = arith.addf %36, %35 : vector<16x128xf32>
    %38 = arith.divf %36, %37 : vector<16x128xf32>
    %39 = arith.truncf %38 : vector<16x128xf32> to vector<16x128xbf16>
    %c0_16 = arith.constant 0 : index
    %c0_17 = arith.constant 0 : index
    %40 = vector.load %arg7[%c0_16, %c0_17] : memref<128x64xbf16, #tpu.memory_space<vmem>>, vector<128x64xbf16>
    %cst_18 = arith.constant dense<0.000000e+00> : vector<16x64xf32>
    %41 = tpu.matmul %39, %40, %cst_18 {dimension_numbers = #tpu.dot_dimension_numbers<[1], [0], [0], [1], [0, 0, 1, 1], [], []>} : vector<16x128xbf16>, vector<128x64xbf16>, vector<16x64xf32> -> vector<16x64xf32>
    %c0_19 = arith.constant 0 : index
    %c0_20 = arith.constant 0 : index
    %42 = vector.load %arg8[%c0_19, %c0_20] : memref<1x64xf32, #tpu.memory_space<vmem>>, vector<1x64xf32>
    %43 = vector.broadcast %42 : vector<1x64xf32> to vector<16x64xf32>
    %44 = arith.addf %41, %43 : vector<16x64xf32>
    %45 = arith.negf %44 : vector<16x64xf32>
    %46 = math.exp %45 : vector<16x64xf32>
    %cst_21 = arith.constant 1.000000e+00 : f32
    %47 = vector.broadcast %cst_21 : f32 to vector<16x64xf32>
    %48 = arith.addf %47, %46 : vector<16x64xf32>
    %49 = arith.divf %47, %48 : vector<16x64xf32>
    %c0_22 = arith.constant 0 : index
    %c0_23 = arith.constant 0 : index
    %50 = vector.load %arg9[%c0_22, %c0_23] : memref<1x64xf32, #tpu.memory_space<vmem>>, vector<1x64xf32>
    %51 = vector.broadcast %50 : vector<1x64xf32> to vector<16x64xf32>
    %52 = arith.mulf %49, %51 : vector<16x64xf32>
    %cst_24 = arith.constant dense<0.000000e+00> : vector<16xf32>
    %53 = vector.multi_reduction <add>, %52, %cst_24 [1] : vector<16x64xf32> to vector<16xf32>
    %54 = vector.shape_cast %53 : vector<16xf32> to vector<16x1xf32>
    %c0_25 = arith.constant 0 : index
    %c0_26 = arith.constant 0 : index
    %55 = vector.load %arg10[%c0_25, %c0_26] : memref<1x1xf32, #tpu.memory_space<vmem>>, vector<1x1xf32>
    %56 = vector.broadcast %55 : vector<1x1xf32> to vector<16x1xf32>
    %57 = arith.addf %54, %56 : vector<16x1xf32>
    %58 = arith.negf %57 : vector<16x1xf32>
    %59 = math.exp %58 : vector<16x1xf32>
    %cst_27 = arith.constant 1.000000e+00 : f32
    %60 = vector.broadcast %cst_27 : f32 to vector<16x1xf32>
    %61 = arith.addf %60, %59 : vector<16x1xf32>
    %62 = arith.divf %60, %61 : vector<16x1xf32>
    %c0_28 = arith.constant 0 : index
    %c0_29 = arith.constant 0 : index
    %63 = vector.load %arg11[%c0_28, %c0_29] : memref<16x1xf32, #tpu.memory_space<vmem>>, vector<16x1xf32>
    tpu.vector_store %arg11[%c0_28, %c0_29], %62 {strides = array<i32>} : memref<16x1xf32, #tpu.memory_space<vmem>>, vector<16x1xf32>,
    return
  }
  func.func @transform_0(%arg0: i32) -> (i32, i32) {
    %c0_i32 = arith.constant 0 : i32
    %c0_i32_0 = arith.constant 0 : i32
    return %arg0, %c0_i32 : i32, i32
  }
  func.func @transform_1(%arg0: i32) -> (i32, i32) {
    %c0_i32 = arith.constant 0 : i32
    %c0_i32_0 = arith.constant 0 : i32
    return %arg0, %c0_i32 : i32, i32
  }
  func.func @transform_2(%arg0: i32) -> (i32, i32) {
    %c0_i32 = arith.constant 0 : i32
    %c0_i32_0 = arith.constant 0 : i32
    return %arg0, %c0_i32 : i32, i32
  }
  func.func @transform_3(%arg0: i32) -> (i32, i32) {
    %c0_i32 = arith.constant 0 : i32
    %c0_i32_0 = arith.constant 0 : i32
    return %arg0, %c0_i32 : i32, i32
  }
  func.func @transform_4(%arg0: i32) -> (i32, i32) {
    %c0_i32 = arith.constant 0 : i32
    %c0_i32_0 = arith.constant 0 : i32
    %c0_i32_1 = arith.constant 0 : i32
    return %c0_i32, %c0_i32_0 : i32, i32
  }
  func.func @transform_5(%arg0: i32) -> (i32, i32) {
    %c0_i32 = arith.constant 0 : i32
    %c0_i32_0 = arith.constant 0 : i32
    %c0_i32_1 = arith.constant 0 : i32
    return %c0_i32, %c0_i32_0 : i32, i32
  }
  func.func @transform_6(%arg0: i32) -> (i32, i32) {
    %c0_i32 = arith.constant 0 : i32
    %c0_i32_0 = arith.constant 0 : i32
    %c0_i32_1 = arith.constant 0 : i32
    return %c0_i32, %c0_i32_0 : i32, i32
  }
  func.func @transform_7(%arg0: i32) -> (i32, i32) {
    %c0_i32 = arith.constant 0 : i32
    %c0_i32_0 = arith.constant 0 : i32
    %c0_i32_1 = arith.constant 0 : i32
    return %c0_i32, %c0_i32_0 : i32, i32
  }
  func.func @transform_8(%arg0: i32) -> (i32, i32) {
    %c0_i32 = arith.constant 0 : i32
    %c0_i32_0 = arith.constant 0 : i32
    %c0_i32_1 = arith.constant 0 : i32
    return %c0_i32, %c0_i32_0 : i32, i32
  }
  func.func @transform_9(%arg0: i32) -> (i32, i32) {
    %c0_i32 = arith.constant 0 : i32
    %c0_i32_0 = arith.constant 0 : i32
    %c0_i32_1 = arith.constant 0 : i32
    return %c0_i32, %c0_i32_0 : i32, i32
  }
  func.func @transform_10(%arg0: i32) -> (i32, i32) {
    %c0_i32 = arith.constant 0 : i32
    %c0_i32_0 = arith.constant 0 : i32
    return %arg0, %c0_i32 : i32, i32
  }
}

</mosaic_0001>

<bundles_post_ra>
// kernel: ncd_forward.1
= control target key start
LH: loop header
LB: loop body
LE: loop exit
PB: predicated region body
PF: predicated region fallthrough
CT: control target
= control target key end

     0   :  { %v575_v0 = vmov 0   ;;  %s722_s2 = inlined_call_operand.vmem [shape: bf16[16,1], index: 2, kind: input, shape index: {}]   ;;  %s723_s5 = inlined_call_operand.vmem [shape: f32[1,128], index: 5, kind: input, shape index: {}]   ;;  %s724_s0 = inlined_call_operand.vmem [shape: bf16[16,32], index: 0, kind: input, shape index: {}]   ;;  %s725_s1 = inlined_call_operand.vmem [shape: bf16[16,32], index: 1, kind: input, shape index: {}]   ;;  %s726_s4 = inlined_call_operand.vmem [shape: bf16[32,128], index: 4, kind: input, shape index: {}]   ;;  %s727_s3 = inlined_call_operand.vmem [shape: f32[16,32], index: 3, kind: input, shape index: {}]   ;;  %s728_s7 = inlined_call_operand.vmem [shape: f32[1,64], index: 7, kind: input, shape index: {}]   ;;  %s729_s6 = inlined_call_operand.vmem [shape: bf16[128,64], index: 6, kind: input, shape index: {}]   ;;  %s730_s8 = inlined_call_operand.vmem [shape: f32[1,64], index: 8, kind: input, shape index: {}]   ;;  %s731_s9 = inlined_call_operand.<no memory space> [shape: f32[1,1], index: 9, kind: input, shape index: {}]   ;;  %s732_s10 = inlined_call_operand.vmem [shape: f32[16,1], index: 10, kind: output, shape index: {}]  }
   0x1   :  { %522 = vset.pattern.permute.xlu0 %v575_v0  ;;  %v518_v1 = vld [vmem:[%s722_s2] sm:$0xff]   ;;  %v500_v50 = vld [vmem:[%s726_s4 + $0x8] sm:$0xff] }
   0x2   :  { %v519_v2 = vunpack.c.l.bf16 %v518_v1  ;;  %v520_v3 = vunpack.c.h.bf16 %v518_v1  ;;  %v510_v32 = vld [vmem:[%s724_s0] sm:$0xff]   ;;  %215 = vmatpush.bf16.msra.mxu0 %v500_v50  ;;  %v502_v50 = vld [vmem:[%s729_s6 + $0x8] sm:$0xff] }
   0x3   :  { %v514_v33 = vld [vmem:[%s725_s1] sm:$0xff]   ;;  %v511_v34 = vunpack.c.l.bf16 %v510_v32  ;;  %v512_v36 = vunpack.c.h.bf16 %v510_v32 }
   0x4   :  { %v450_v4 = vmul.f32 -1.442695, %v519_v2  ;;  %v451_v5 = vmul.f32 -1.442695, %v520_v3  ;;  %v515_v35 = vunpack.c.l.bf16 %v514_v33  ;;  %v516_v37 = vunpack.c.h.bf16 %v514_v33  ;;  %v499_v53 = vld [vmem:[%s726_s4] sm:$0xff] }
   0x5   :  { %v446_v38 = vmul.f32 -1.442695, %v511_v34  ;;  %v447_v40 = vmul.f32 -1.442695, %v512_v36  ;;  %v180_v36 = vld [vmem:[%s727_s3] sm:$0xff] }
   0x6   :  { %527 = vpow2.f32 %v450_v4  ;;  %v448_v39 = vmul.f32 -1.442695, %v515_v35  ;;  %v449_v41 = vmul.f32 -1.442695, %v516_v37  ;;  %216 = vmatpush.bf16.msra.mxu0 %v499_v53  ;;  %v181_v37 = vld [vmem:[%s727_s3 + $0x8] sm:$0xff]  ;;  %v501_v53 = vld [vmem:[%s729_s6] sm:$0xff] }
   0x7   :  { %529 = vpow2.f32 %v451_v5 }
   0xc   :  { %v528_v6 = vpop.eup %527 }
   0xd   :  { %v530_v7 = vpop.eup %529  ;;  %v132_v8 = vadd.f32 1.0, %v528_v6 }
   0xe   :  { %v133_v9 = vadd.f32 1.0, %v530_v7 }
   0xf   :  { %531 = vrcp.f32 %v132_v8  ;;  %v145_v13 = vand.u32 2147483648, %v132_v8  ;;  %vm139_vm0 = vweird.f32 %v132_v8  ;;  %v143_v16 = vand.u32 2147483647, %v132_v8 }
  0x10   :  { %533 = vrcp.f32 %v133_v9  ;;  %vm154_vm2 = vweird.f32 %v133_v9  ;;  %v160_v21 = vand.u32 2147483648, %v133_v9  ;;  %v158_v23 = vand.u32 2147483647, %v133_v9 }
  0x11   :  { %v146_v19 = vor.u32 1.1754944e-38, %v145_v13  ;;  %vm144_vm5 = vcmp.eq.f32.partialorder %v143_v16, 8.507059e+37  ;;  %535 = vpow2.f32 %v446_v38 }
  0x12   :  { %v161_v27 = vor.u32 1.1754944e-38, %v160_v21  ;;  %vm159_vm7 = vcmp.eq.f32.partialorder %v158_v23, 8.507059e+37  ;;  %537 = vpow2.f32 %v448_v39 }
  0x13   :  { %539 = vpow2.f32 %v447_v40 }
  0x14   :  { %541 = vpow2.f32 %v449_v41 }
  0x15   :  { %v532_v10 = vpop.eup %531 }
  0x16   :  { %v534_v11 = vpop.eup %533  ;;  %v135_v12 = vmul.f32 %v532_v10, %v132_v8  ;;  %vm140_vm1 = vweird.f32 %v532_v10 }
  0x17   :  { %v150_v14 = vmul.f32 %v534_v11, %v133_v9  ;;  %vm155_vm3 = vweird.f32 %v534_v11  ;;  %vm141_vm4 = vmor %vm139_vm0, %vm140_vm1  ;;  %v536_v42 = vpop.eup %535 }
  0x18   :  { %v136_v15 = vsub.f32 1.0, %v135_v12  ;;  %vm156_vm6 = vmor %vm154_vm2, %vm155_vm3  ;;  %v538_v43 = vpop.eup %537  ;;  %v48_v46 = vadd.f32 1.0, %v536_v42 }
  0x19   :  { %v151_v17 = vsub.f32 1.0, %v150_v14  ;;  %v540_v44 = vpop.eup %539  ;;  %v90_v47 = vadd.f32 1.0, %v538_v43  ;;  %v508_v43 = vld [vmem:[%s729_s6 + $0x38] sm:$0xff] }
  0x1a   :  { %v137_v18 = vmul.f32 %v532_v10, %v136_v15  ;;  %v542_v45 = vpop.eup %541  ;;  %v49_v48 = vadd.f32 1.0, %v540_v44  ;;  %543 = vrcp.f32 %v48_v46  ;;  %vm55_vm8 = vweird.f32 %v48_v46  ;;  %330 = vmatpush.bf16.msra.mxu1 %v508_v43  ;;  %v507_v44 = vld [vmem:[%s729_s6 + $0x30] sm:$0xff] }
  0x1b   :  { %v152_v20 = vmul.f32 %v534_v11, %v151_v17  ;;  %v91_v49 = vadd.f32 1.0, %v542_v45  ;;  %545 = vrcp.f32 %v90_v47  ;;  %v61_v2 = vand.u32 2147483648, %v48_v46  ;;  %v506_v45 = vld [vmem:[%s729_s6 + $0x28] sm:$0xff] }
  0x1c   :  { %v138_v22 = vadd.f32 %v532_v10, %v137_v18  ;;  %547 = vrcp.f32 %v49_v48  ;;  %v103_v3 = vand.u32 2147483648, %v90_v47  ;;  %vm97_vm10 = vweird.f32 %v90_v47 }
  0x1d   :  { %v153_v24 = vadd.f32 %v534_v11, %v152_v20  ;;  %549 = vrcp.f32 %v91_v49  ;;  %v59_v7 = vand.u32 2147483647, %v48_v46  ;;  %vm70_vm12 = vweird.f32 %v49_v48 }
  0x1e   :  { %v142_v25 = vsel %vm141_vm4, %v532_v10, %v138_v22  ;;  %v101_v10 = vand.u32 2147483647, %v90_v47  ;;  %vm112_vm15 = vweird.f32 %v91_v49  ;;  %v76_v12 = vand.u32 2147483648, %v49_v48  ;;  %331 = vmatpush.bf16.msra.mxu1 %v507_v44 }
  0x1f   :  { %v147_v26 = vsel %vm144_vm5, %v146_v19, %v142_v25  ;;  %v157_v29 = vsel %vm156_vm6, %v534_v11, %v153_v24  ;;  %v118_v13 = vand.u32 2147483648, %v91_v49  ;;  %v74_v16 = vand.u32 2147483647, %v49_v48 }
  0x20   :  { %v164_v28 = vmul.f32 10.0, %v147_v26  ;;  %v162_v30 = vsel %vm159_vm7, %v161_v27, %v157_v29  ;;  %v544_v51 = vpop.eup %543  ;;  %v116_v18 = vand.u32 2147483647, %v91_v49  ;;  %v62_v19 = vor.u32 1.1754944e-38, %v61_v2 }
  0x21   :  { %v165_v31 = vmul.f32 10.0, %v162_v30  ;;  %v546_v52 = vpop.eup %545  ;;  %v51_v56 = vmul.f32 %v544_v51, %v48_v46  ;;  %vm56_vm9 = vweird.f32 %v544_v51  ;;  %v104_v20 = vor.u32 1.1754944e-38, %v103_v3  ;;  %v505_v46 = vld [vmem:[%s729_s6 + $0x20] sm:$0xff] }
  0x22   :  { %170 = vperm.xlu0 %522, %v164_v28   ;;  %v548_v54 = vpop.eup %547  ;;  %v93_v57 = vmul.f32 %v546_v52, %v90_v47  ;;  %vm98_vm11 = vweird.f32 %v546_v52  ;;  %vm646_vm14 = vmor %vm55_vm8, %vm56_vm9  ;;  %vm60_vm4 = vcmp.eq.f32.partialorder %v59_v7, 8.507059e+37  ;;  %vm102_vm5 = vcmp.eq.f32.partialorder %v101_v10, 8.507059e+37  ;;  %332 = vmatpush.bf16.msra.mxu1 %v506_v45  ;;  %v504_v47 = vld [vmem:[%s729_s6 + $0x18] sm:$0xff] }
  0x23   :  { %v550_v55 = vpop.eup %549  ;;  %v66_v58 = vmul.f32 %v548_v54, %v49_v48  ;;  %v52_v60 = vsub.f32 1.0, %v51_v56  ;;  %vm71_vm13 = vweird.f32 %v548_v54  ;;  %vm650_vm1 = vmor %vm97_vm10, %vm98_vm11  ;;  %v77_v24 = vor.u32 1.1754944e-38, %v76_v12  ;;  %v503_v48 = vld [vmem:[%s729_s6 + $0x10] sm:$0xff] }
  0x24   :  { %v108_v59 = vmul.f32 %v550_v55, %v91_v49  ;;  %v94_v61 = vsub.f32 1.0, %v93_v57  ;;  %vm113_vm0 = vweird.f32 %v550_v55  ;;  %vm654_vm2 = vmor %vm70_vm12, %vm71_vm13  ;;  %v119_v25 = vor.u32 1.1754944e-38, %v118_v13  ;;  %v523_v49 = vld [vmem:[%s723_s5] ss:$0 sm:$0xff] }
  0x25   :  { %v67_v62 = vsub.f32 1.0, %v66_v58  ;;  %v53_v0 = vmul.f32 %v544_v51, %v52_v60  ;;  %vm658_vm3 = vmor %vm112_vm15, %vm113_vm0  ;;  %vm75_vm6 = vcmp.eq.f32.partialorder %v74_v16, 8.507059e+37  ;;  %vm117_vm7 = vcmp.eq.f32.partialorder %v116_v18, 8.507059e+37 }
  0x26   :  { %v109_v63 = vsub.f32 1.0, %v108_v59  ;;  %v95_v1 = vmul.f32 %v546_v52, %v94_v61  ;;  %vm205_vm8 = vcmask 261120   ;;  %333 = vmatpush.bf16.msra.mxu1 %v505_v46 }
  0x27   :  { %v68_v4 = vmul.f32 %v548_v54, %v67_v62  ;;  %v54_v6 = vadd.f32 %v544_v51, %v53_v0 }
  0x28   :  { %v110_v5 = vmul.f32 %v550_v55, %v109_v63  ;;  %v96_v9 = vadd.f32 %v546_v52, %v95_v1 }
  0x29   :  { %v69_v14 = vadd.f32 %v548_v54, %v68_v4  ;;  %v58_v22 = vsel %vm646_vm14, %v544_v51, %v54_v6 }
  0x2a   :  { %175 = vperm.xlu0 %522, %v165_v31   ;;  %v111_v17 = vadd.f32 %v550_v55, %v110_v5  ;;  %v100_v23 = vsel %vm650_vm1, %v546_v52, %v96_v9  ;;  %v63_v29 = vsel %vm60_vm4, %v62_v19, %v58_v22  ;;  %334 = vmatpush.bf16.msra.mxu1 %v504_v47  ;;  %v524_v19 = vld [vmem:[%s728_s7] ss:$0 sm:$0xff] }
  0x2b   :  { %v73_v26 = vsel %vm654_vm2, %v548_v54, %v69_v14  ;;  %v105_v30 = vsel %vm102_vm5, %v104_v20, %v100_v23  ;;  %vm388_vm5 = vcmask 523264  }
  0x2c   :  { %v115_v27 = vsel %vm658_vm3, %v550_v55, %v111_v17  ;;  %v78_v31 = vsel %vm75_vm6, %v77_v24, %v73_v26  ;;  %v166_v33 = vsub.f32 %v63_v29, %v105_v30 }
  0x2d   :  { %v120_v32 = vsel %vm117_vm7, %v119_v25, %v115_v27  ;;  %v15_v25 = vstv %s731_s9 }
  0x2e   :  { %v167_v34 = vsub.f32 %v78_v31, %v120_v32  ;;  %335 = vmatpush.bf16.msra.mxu1 %v503_v48  ;;  %16 = vst [vmem:[#allocation2] sm:$0x1] %v15_v25 }
  0x32   :  { %336 = vmatpush.bf16.msra.mxu1 %v502_v50 }
  0x36   :  { %337 = vmatpush.bf16.msra.mxu1 %v501_v53 }
  0x94   :  { %v171_v28 = vpop.permute.xlu0 %170 }
  0x95   :  { %v178_v35 = vmul.f32 %v171_v28, %v166_v33 }
  0x97   :  { %v182_v40 = vmul.f32 %v180_v36, %v178_v35 }
  0x9c   :  { %v176_v38 = vpop.permute.xlu0 %175 }
  0x9d   :  { %v179_v39 = vmul.f32 %v176_v38, %v167_v34  ;;  %v525_v38 = vld [vmem:[%s730_s8] ss:$0 sm:$0xff] }
  0x9f   :  { %v183_v41 = vmul.f32 %v181_v37, %v179_v39 }
  0xa1   :  { %v184_v42 = vpack.c.bf16 %v183_v41, %v182_v40 }
  0xa3   :  { %460 = vmatmul.msk.bf16.vlgmr.msra.gmra.mxu0 %vm205_vm8, %v184_v42 }
 0x120   :  { %v218_v51 = vpop.f32.mrf.mxu0 }
 0x121   :  { %v219_v52 = vadd.f32 %v523_v49, %v218_v51 }
 0x123   :  { %v461_v54 = vmul.f32 -1.442695, %v219_v52 }
 0x125   :  { %551 = vpow2.f32 %v461_v54 }
 0x128   :  { %v220_v55 = vpop.f32.mrf.mxu0 }
 0x129   :  { %v221_v56 = vadd.f32 %v523_v49, %v220_v55 }
 0x12b   :  { %v552_v57 = vpop.eup %551  ;;  %v462_v58 = vmul.f32 -1.442695, %v221_v56  ;;  %v526_v56 = vld [vmem:[#allocation2] ss:$0 sm:$0xff] }
 0x12c   :  { %v229_v59 = vadd.f32 1.0, %v552_v57 }
 0x12d   :  { %553 = vpow2.f32 %v462_v58 }
 0x12e   :  { %555 = vrcp.f32 %v229_v59  ;;  %vm236_vm10 = vweird.f32 %v229_v59  ;;  %v242_v6 = vand.u32 2147483648, %v229_v59  ;;  %v240_v8 = vand.u32 2147483647, %v229_v59 }
 0x130   :  { %v243_v13 = vor.u32 1.1754944e-38, %v242_v6  ;;  %vm241_vm15 = vcmp.eq.f32.partialorder %v240_v8, 8.507059e+37 }
 0x133   :  { %v554_v60 = vpop.eup %553 }
 0x134   :  { %v556_v61 = vpop.eup %555  ;;  %v230_v62 = vadd.f32 1.0, %v554_v60 }
 0x135   :  { %v232_v63 = vmul.f32 %v556_v61, %v229_v59  ;;  %vm237_vm9 = vweird.f32 %v556_v61 }
 0x136   :  { %557 = vrcp.f32 %v230_v62  ;;  %v257_v7 = vand.u32 2147483648, %v230_v62  ;;  %v255_v10 = vand.u32 2147483647, %v230_v62  ;;  %vm238_vm12 = vmor %vm236_vm10, %vm237_vm9  ;;  %vm251_vm13 = vweird.f32 %v230_v62 }
 0x137   :  { %v233_v0 = vsub.f32 1.0, %v232_v63 }
 0x138   :  { %v258_v14 = vor.u32 1.1754944e-38, %v257_v7  ;;  %vm256_vm0 = vcmp.eq.f32.partialorder %v255_v10, 8.507059e+37 }
 0x139   :  { %v234_v1 = vmul.f32 %v556_v61, %v233_v0 }
 0x13b   :  { %v235_v4 = vadd.f32 %v556_v61, %v234_v1 }
 0x13c   :  { %v558_v2 = vpop.eup %557 }
 0x13d   :  { %v247_v3 = vmul.f32 %v558_v2, %v230_v62  ;;  %vm252_vm11 = vweird.f32 %v558_v2  ;;  %v239_v11 = vsel %vm238_vm12, %v556_v61, %v235_v4  ;;  %vm439_vm12 = vcmask 7168  }
 0x13e   :  { %vm253_vm14 = vmor %vm251_vm13, %vm252_vm11  ;;  %v244_v16 = vsel %vm241_vm15, %v243_v13, %v239_v11 }
 0x13f   :  { %v248_v5 = vsub.f32 1.0, %v247_v3 }
 0x141   :  { %v249_v9 = vmul.f32 %v558_v2, %v248_v5 }
 0x143   :  { %v250_v12 = vadd.f32 %v558_v2, %v249_v9 }
 0x145   :  { %v254_v15 = vsel %vm253_vm14, %v558_v2, %v250_v12 }
 0x146   :  { %v259_v17 = vsel %vm256_vm0, %v258_v14, %v254_v15 }
 0x147   :  { %v261_v18 = vpack.c.bf16 %v259_v17, %v244_v16 }
 0x149   :  { %338 = vmatmul.bf16.vlgmr.msra.gmra.mxu1 %v261_v18 }
 0x1c6   :  { %v339_v20 = vpop.f32.mrf.mxu1 }
 0x1c7   :  { %v340_v21 = vadd.f32 %v524_v19, %v339_v20 }
 0x1c9   :  { %v495_v22 = vmul.f32 -1.442695, %v340_v21 }
 0x1cb   :  { %559 = vpow2.f32 %v495_v22 }
 0x1ce   :  { %v341_v23 = vpop.f32.mrf.mxu1 }
 0x1cf   :  { %v342_v24 = vadd.f32 %v524_v19, %v341_v23 }
 0x1d1   :  { %v560_v26 = vpop.eup %559  ;;  %v496_v27 = vmul.f32 -1.442695, %v342_v24 }
 0x1d2   :  { %v350_v28 = vadd.f32 1.0, %v560_v26 }
 0x1d3   :  { %561 = vpow2.f32 %v496_v27 }
 0x1d4   :  { %563 = vrcp.f32 %v350_v28  ;;  %v363_v34 = vand.u32 2147483648, %v350_v28  ;;  %v361_v36 = vand.u32 2147483647, %v350_v28  ;;  %vm357_vm2 = vweird.f32 %v350_v28 }
 0x1d6   :  { %v364_v40 = vor.u32 1.1754944e-38, %v363_v34  ;;  %vm362_vm4 = vcmp.eq.f32.partialorder %v361_v36, 8.507059e+37 }
 0x1d9   :  { %v562_v29 = vpop.eup %561 }
 0x1da   :  { %v564_v30 = vpop.eup %563  ;;  %v351_v31 = vadd.f32 1.0, %v562_v29 }
 0x1db   :  { %v353_v32 = vmul.f32 %v564_v30, %v350_v28  ;;  %vm358_vm1 = vweird.f32 %v564_v30 }
 0x1dc   :  { %565 = vrcp.f32 %v351_v31  ;;  %vm359_vm3 = vmor %vm357_vm2, %vm358_vm1  ;;  %v378_v46 = vand.u32 2147483648, %v351_v31  ;;  %v376_v49 = vand.u32 2147483647, %v351_v31  ;;  %vm372_vm7 = vweird.f32 %v351_v31 }
 0x1dd   :  { %v354_v33 = vsub.f32 1.0, %v353_v32 }
 0x1de   :  { %v379_v51 = vor.u32 1.1754944e-38, %v378_v46  ;;  %vm377_vm9 = vcmp.eq.f32.partialorder %v376_v49, 8.507059e+37 }
 0x1df   :  { %v355_v35 = vmul.f32 %v564_v30, %v354_v33 }
 0x1e1   :  { %v356_v37 = vadd.f32 %v564_v30, %v355_v35 }
 0x1e2   :  { %v566_v39 = vpop.eup %565 }
 0x1e3   :  { %v360_v41 = vsel %vm359_vm3, %v564_v30, %v356_v37  ;;  %v368_v42 = vmul.f32 %v566_v39, %v351_v31  ;;  %vm373_vm6 = vweird.f32 %v566_v39 }
 0x1e4   :  { %v365_v43 = vsel %vm362_vm4, %v364_v40, %v360_v41  ;;  %vm374_vm8 = vmor %vm372_vm7, %vm373_vm6 }
 0x1e5   :  { %v386_v44 = vmul.f32 %v525_v38, %v365_v43  ;;  %v369_v45 = vsub.f32 1.0, %v368_v42 }
 0x1e7   :  { %v389_v47 = vsel %vm388_vm5, %v386_v44, 0.0  ;;  %v370_v48 = vmul.f32 %v566_v39, %v369_v45 }
 0x1e8   :  { %390 = vadd.xlane.f32.xlu1 %v389_v47 }
 0x1e9   :  { %v371_v50 = vadd.f32 %v566_v39, %v370_v48 }
 0x1eb   :  { %v375_v52 = vsel %vm374_vm8, %v566_v39, %v371_v50 }
 0x1ec   :  { %v380_v53 = vsel %vm377_vm9, %v379_v51, %v375_v52 }
 0x1ed   :  { %v387_v54 = vmul.f32 %v525_v38, %v380_v53 }
 0x1ef   :  { %v392_v55 = vsel %vm388_vm5, %v387_v54, 0.0 }
 0x1f0   :  { %393 = vadd.xlane.f32.xlu1 %v392_v55 }
 0x25b   :  { %v391_v57 = vpop.xlane.xlu1 %390 }
 0x25c   :  { %v399_v58 = vadd.f32 %v526_v56, %v391_v57 }
 0x25e   :  { %v497_v59 = vmul.f32 -1.442695, %v399_v58 }
 0x260   :  { %567 = vpow2.f32 %v497_v59 }
 0x263   :  { %v394_v60 = vpop.xlane.xlu1 %393 }
 0x264   :  { %v400_v61 = vadd.f32 %v526_v56, %v394_v60 }
 0x266   :  { %v568_v62 = vpop.eup %567  ;;  %v498_v63 = vmul.f32 -1.442695, %v400_v61 }
 0x267   :  { %v407_v0 = vadd.f32 1.0, %v568_v62 }
 0x268   :  { %569 = vpow2.f32 %v498_v63 }
 0x269   :  { %571 = vrcp.f32 %v407_v0  ;;  %v420_v6 = vand.u32 2147483648, %v407_v0  ;;  %v418_v8 = vand.u32 2147483647, %v407_v0  ;;  %vm414_vm11 = vweird.f32 %v407_v0 }
 0x26b   :  { %v421_v11 = vor.u32 1.1754944e-38, %v420_v6  ;;  %vm419_vm14 = vcmp.eq.f32.partialorder %v418_v8, 8.507059e+37 }
 0x26e   :  { %v570_v1 = vpop.eup %569 }
 0x26f   :  { %v572_v2 = vpop.eup %571  ;;  %v408_v3 = vadd.f32 1.0, %v570_v1 }
 0x270   :  { %v410_v4 = vmul.f32 %v572_v2, %v407_v0  ;;  %vm415_vm10 = vweird.f32 %v572_v2 }
 0x271   :  { %573 = vrcp.f32 %v408_v3  ;;  %vm416_vm13 = vmor %vm414_vm11, %vm415_vm10  ;;  %v435_v16 = vand.u32 2147483648, %v408_v3  ;;  %v433_v18 = vand.u32 2147483647, %v408_v3  ;;  %vm429_vm0 = vweird.f32 %v408_v3 }
 0x272   :  { %v411_v5 = vsub.f32 1.0, %v410_v4 }
 0x273   :  { %v436_v20 = vor.u32 1.1754944e-38, %v435_v16  ;;  %vm434_vm2 = vcmp.eq.f32.partialorder %v433_v18, 8.507059e+37 }
 0x274   :  { %v412_v7 = vmul.f32 %v572_v2, %v411_v5 }
 0x276   :  { %v413_v9 = vadd.f32 %v572_v2, %v412_v7 }
 0x277   :  { %v574_v10 = vpop.eup %573 }
 0x278   :  { %v417_v12 = vsel %vm416_vm13, %v572_v2, %v413_v9  ;;  %v425_v13 = vmul.f32 %v574_v10, %v408_v3  ;;  %vm430_vm15 = vweird.f32 %v574_v10 }
 0x279   :  { %v422_v14 = vsel %vm419_vm14, %v421_v11, %v417_v12  ;;  %vm431_vm1 = vmor %vm429_vm0, %vm430_vm15 }
 0x27a   :  { %440 = vst.msk [vmem:[%s732_s10] sm:$0xff] %vm439_vm12, %v422_v14  ;;  %v426_v15 = vsub.f32 1.0, %v425_v13 }
 0x27c   :  { %v427_v17 = vmul.f32 %v574_v10, %v426_v15 }
 0x27e   :  { %v428_v19 = vadd.f32 %v574_v10, %v427_v17 }
 0x280   :  { %v432_v21 = vsel %vm431_vm1, %v574_v10, %v428_v19 }
 0x281   :  { %v437_v22 = vsel %vm434_vm2, %v436_v20, %v432_v21 }
 0x282   :  { %441 = vst.msk [vmem:[%s732_s10 + $0x8] sm:$0xff] %vm439_vm12, %v437_v22 }

</bundles_post_ra>
